<compile_context>
chip_gen: v7x
topology: tpu7x:2x2x1
jax: 0.10.0
libtpu: 0.0.40
codegen_flags: <defaults>
</compile_context>

<pallas_src>
import functools

import numpy as np
import jax
import jax.numpy as jnp
from jax.experimental import pallas as pl
from jax.experimental.pallas import tpu as pltpu

KSIZE = 11
SIGMA = 1.5
K1 = 0.01
K2 = 0.03


def _gaussian_1d(kernel_size: int = KSIZE, sigma: float = SIGMA) -> np.ndarray:
    # Same construction as torchmetrics._gaussian
    dist = np.arange((1 - kernel_size) / 2.0, (1 + kernel_size) / 2.0, 1.0)
    g = np.exp(-((dist / sigma) ** 2) / 2.0)
    return (g / g.sum()).astype(np.float32)


def _band_matrix(full: int, valid: int, taps: np.ndarray) -> np.ndarray:
    # m[c, j] = taps[c - j] for 0 <= c - j < KSIZE  ->  (a @ m)[:, j] is the
    # valid 1-D Gaussian correlation of a along its last axis.
    m = np.zeros((full, valid), np.float32)
    for j in range(valid):
        m[j:j + KSIZE, j] = taps
    return m


def _vmem_capacity_bytes() -> int:
    try:
        info = pltpu.get_tpu_info()
        cap = getattr(info, "vmem_capacity_bytes", None)
        if cap:
            return int(cap)
    except Exception:
        pass
    return 64 * 1024 * 1024  # conservative (v7x per-TC)


def _is_single_tensorcore_chip() -> bool:
    # v5e / v6e have one TensorCore per chip; v4 / v5p (megacore) and v7x can
    # shard a 'parallel' grid axis across two cores.
    try:
        kind = jax.devices()[0].device_kind.lower().replace(" ", "")
    except Exception:
        return False
    return any(t in kind for t in ("v5e", "v5lite", "v6e", "v6lite"))


def _ssim_kernel(x_ref, y_ref, ght_ref, gw_ref, o_ref, *,
                 c1, c2, bc, nc, h, w, hout, wout, mm_dtype):
    f32 = jnp.float32
    x = x_ref[...].astype(f32)          # (bc, h, w)
    y = y_ref[...].astype(f32)

    # Banded Gaussian matrices, broadcast once per step across the channel
    # batch so both blur passes are the supported 'bqk,bkd->bqd' batched
    # matmul pattern (no transposes, no concatenated slab).
    ght_b = jnp.broadcast_to(ght_ref[...].astype(mm_dtype)[None],
                             (bc, hout, h))              # (bc, hout, h)
    gw_b = jnp.broadcast_to(gw_ref[...].astype(mm_dtype)[None],
                            (bc, w, wout))               # (bc, w, wout)

    def blur(a):                         # a: (bc, h, w) float32
        am = a.astype(mm_dtype)
        # H pass (contract h):  (bc, hout, h) @ (bc, h, w) -> (bc, hout, w)
        t = jnp.einsum('coh,chw->cow', ght_b, am,
                       preferred_element_type=f32)
        # W pass (contract w):  (bc, hout, w) @ (bc, w, wout) -> (bc, hout, wout)
        return jnp.einsum('cow,cwv->cov', t.astype(mm_dtype), gw_b,
                          preferred_element_type=f32)

    mu1 = blur(x)
    mu2 = blur(y)
    e11 = blur(x * x)
    e22 = blur(y * y)
    e12 = blur(x * y)

    mu1_sq = mu1 * mu1
    mu2_sq = mu2 * mu2
    mu12 = mu1 * mu2
    sigma1_sq = e11 - mu1_sq
    sigma2_sq = e22 - mu2_sq
    sigma12 = e12 - mu12

    num = (2.0 * mu12 + c1) * (2.0 * sigma12 + c2)
    den = (mu1_sq + mu2_sq + c1) * (sigma1_sq + sigma2_sq + c2)
    ssim = num / den                     # exact divide: matches torchmetrics f32

    # Ragged last grid step: mask out channels >= NC (select => NaN-safe).
    i = pl.program_id(0)
    cidx = i * bc + jax.lax.broadcasted_iota(jnp.int32, (bc, 1, 1), 0)
    ssim = jnp.where(cidx < nc, ssim, 0.0)
    partial = jnp.sum(ssim)

    # Per-step partial sum in lane 0 of this step's private (1,1,128) block.
    lane = jax.lax.broadcasted_iota(jnp.int32, (1, 1, 128), 2)
    o_ref[...] = jnp.where(lane == 0, partial, 0.0)


def ssim_loss(img1, img2, data_range: float = 1.0, matmul_dtype=None):
    """1 - SSIM(img1, img2); img1/img2 are NCHW; returns a scalar f32."""
    assert img1.shape == img2.shape and img1.ndim == 4
    N, C, H, W = img1.shape
    NC = N * C
    hout = H - KSIZE + 1
    wout = W - KSIZE + 1
    assert hout > 0 and wout > 0, "spatial dims must be >= kernel_size (11)"

    x = img1.reshape(NC, H, W)
    y = img2.reshape(NC, H, W)
    if x.dtype not in (jnp.float32, jnp.bfloat16, jnp.float16):
        # ints / doubles: widen in the wrapper; float inputs stay narrow in
        # HBM and are cast to f32 inside the kernel.
        x = x.astype(jnp.float32)
        y = y.astype(jnp.float32)

    if matmul_dtype is None:
        # bf16 inputs stay bf16 on the MXU; f32 inputs keep exact f32 matmuls.
        matmul_dtype = jnp.bfloat16 if x.dtype == jnp.bfloat16 else jnp.float32

    taps = _gaussian_1d()
    ght = jnp.asarray(np.ascontiguousarray(_band_matrix(H, hout, taps).T))  # (hout, H)
    gw = jnp.asarray(_band_matrix(W, wout, taps))                           # (W, wout)

    # ---- generation-aware sizing ------------------------------------------
    vmem_cap = _vmem_capacity_bytes()
    vmem_limit = max(int(vmem_cap * 0.5),
                     min(int(vmem_cap * 0.8), vmem_cap - (12 << 20)))
    budget = int(vmem_limit * 0.7)

    in_bytes = 2 if x.dtype in (jnp.bfloat16, jnp.float16) else 4
    # per channel per step: double-buffered x/y blocks + ~18 f32 plane-equiv
    # of temporaries (casts, products, band broadcasts, blur results, SSIM).
    per_channel = 4 * H * W * in_bytes + 18 * H * W * 4

    bc = max(1, min(NC, 32, budget // per_channel))
    if (not _is_single_tensorcore_chip()) and NC >= 2:
        # Keep >= 2 grid steps so the 'parallel' axis can shard across TCs.
        bc = min(bc, (NC + 1) // 2)
    g = pl.cdiv(NC, bc)

    c1 = (K1 * data_range) ** 2
    c2 = (K2 * data_range) ** 2
    kernel = functools.partial(
        _ssim_kernel, c1=c1, c2=c2, bc=bc, nc=NC, h=H, w=W,
        hout=hout, wout=wout, mm_dtype=matmul_dtype)

    partials = pl.pallas_call(
        kernel,
        out_shape=jax.ShapeDtypeStruct((g, 1, 128), jnp.float32),
        grid_spec=pltpu.PrefetchScalarGridSpec(
            num_scalar_prefetch=0,
            grid=(g,),
            in_specs=[
                pl.BlockSpec((bc, H, W), lambda i: (i, 0, 0)),
                pl.BlockSpec((bc, H, W), lambda i: (i, 0, 0)),
                pl.BlockSpec((hout, H), lambda i: (0, 0)),
                pl.BlockSpec((W, wout), lambda i: (0, 0)),
            ],
            out_specs=pl.BlockSpec((1, 1, 128), lambda i: (i, 0, 0)),
        ),
        compiler_params=pltpu.CompilerParams(
            dimension_semantics=("parallel",),
            vmem_limit_bytes=vmem_limit),
    )(x, y, ght, gw)

    mean_ssim = jnp.sum(partials) / float(NC * hout * wout)
    return (1.0 - mean_ssim).astype(jnp.float32)


if __name__ == "__main__":
    key = jax.random.PRNGKey(0)
    k1, k2 = jax.random.split(key)
    # data_range=1 -> images in [0, 1]
    img1 = jax.random.uniform(k1, (2, 4, 16, 16), dtype=jnp.float32)
    img2 = jax.random.uniform(k2, (2, 4, 16, 16), dtype=jnp.float32)

    loss = jax.jit(ssim_loss)(img1, img2)
    jax.block_until_ready(loss)

    # sanity: identical images -> loss == 0
    zero_loss = jax.jit(ssim_loss)(img1, img1)
    jax.block_until_ready(zero_loss)
    assert abs(float(zero_loss)) < 1e-5, float(zero_loss)
    assert 0.0 < float(loss) <= 2.0, float(loss)

    print("KERNEL_OK")
</pallas_src>

<mosaic_0001>
module attributes {stable_mosaic.version = 11 : i64} {
  func.func @_ssim_kernel(%arg0: i32, %arg1: memref<4x16x16xf32, #tpu.memory_space<vmem>>, %arg2: memref<4x16x16xf32, #tpu.memory_space<vmem>>, %arg3: memref<6x16xf32, #tpu.memory_space<vmem>>, %arg4: memref<16x6xf32, #tpu.memory_space<vmem>>, %arg5: memref<1x1x128xf32, #tpu.memory_space<vmem>>) attributes {dimension_semantics = [#tpu.dimension_semantics<parallel>], iteration_bounds = array<i64: 2>, scalar_prefetch = 0 : i64, scratch_operands = 0 : i64, tpu.core_type = #tpu.core_type<tc>, window_params = [{transform_indices = @transform_0, window_bounds = array<i64: 4, 16, 16>}, {transform_indices = @transform_1, window_bounds = array<i64: 4, 16, 16>}, {pipeline_mode = #tpu.pipeline_mode<synchronous>, transform_indices = @transform_2, window_bounds = array<i64: 6, 16>}, {pipeline_mode = #tpu.pipeline_mode<synchronous>, transform_indices = @transform_3, window_bounds = array<i64: 16, 6>}, {transform_indices = @transform_4, window_bounds = array<i64: 1, 1, 128>}]} {
    %c0 = arith.constant 0 : index
    %c0_0 = arith.constant 0 : index
    %c0_1 = arith.constant 0 : index
    %0 = vector.load %arg1[%c0, %c0_0, %c0_1] : memref<4x16x16xf32, #tpu.memory_space<vmem>>, vector<4x16x16xf32>
    %c0_2 = arith.constant 0 : index
    %c0_3 = arith.constant 0 : index
    %c0_4 = arith.constant 0 : index
    %1 = vector.load %arg2[%c0_2, %c0_3, %c0_4] : memref<4x16x16xf32, #tpu.memory_space<vmem>>, vector<4x16x16xf32>
    %c0_5 = arith.constant 0 : index
    %c0_6 = arith.constant 0 : index
    %2 = vector.load %arg3[%c0_5, %c0_6] : memref<6x16xf32, #tpu.memory_space<vmem>>, vector<6x16xf32>
    %3 = vector.shape_cast %2 : vector<6x16xf32> to vector<1x6x16xf32>
    %4 = vector.shape_cast %3 : vector<1x6x16xf32> to vector<1x6x16xf32>
    %5 = vector.broadcast %4 : vector<1x6x16xf32> to vector<4x6x16xf32>
    %c0_7 = arith.constant 0 : index
    %c0_8 = arith.constant 0 : index
    %6 = vector.load %arg4[%c0_7, %c0_8] : memref<16x6xf32, #tpu.memory_space<vmem>>, vector<16x6xf32>
    %7 = vector.shape_cast %6 : vector<16x6xf32> to vector<1x16x6xf32>
    %8 = vector.shape_cast %7 : vector<1x16x6xf32> to vector<1x16x6xf32>
    %9 = vector.broadcast %8 : vector<1x16x6xf32> to vector<4x16x6xf32>
    "tpu.trace_start"() <{level = 10 : i32, message = "coh,chw->cow"}> : () -> ()
    %cst = arith.constant dense<0.000000e+00> : vector<4x6x16xf32>
    %10 = tpu.matmul %5, %0, %cst {dimension_numbers = #tpu.dot_dimension_numbers<[2], [1], [1], [2], [0, 0, 0, 1, 1, 2], [0], [0]>} : vector<4x6x16xf32>, vector<4x16x16xf32>, vector<4x6x16xf32> -> vector<4x6x16xf32>
    "tpu.trace_stop"() : () -> ()
    "tpu.trace_start"() <{level = 10 : i32, message = "cow,cwv->cov"}> : () -> ()
    %cst_9 = arith.constant dense<0.000000e+00> : vector<4x6x6xf32>
    %11 = tpu.matmul %10, %9, %cst_9 {dimension_numbers = #tpu.dot_dimension_numbers<[2], [1], [1], [2], [0, 0, 0, 1, 1, 2], [0], [0]>} : vector<4x6x16xf32>, vector<4x16x6xf32>, vector<4x6x6xf32> -> vector<4x6x6xf32>
    "tpu.trace_stop"() : () -> ()
    "tpu.trace_start"() <{level = 10 : i32, message = "coh,chw->cow"}> : () -> ()
    %cst_10 = arith.constant dense<0.000000e+00> : vector<4x6x16xf32>
    %12 = tpu.matmul %5, %1, %cst_10 {dimension_numbers = #tpu.dot_dimension_numbers<[2], [1], [1], [2], [0, 0, 0, 1, 1, 2], [0], [0]>} : vector<4x6x16xf32>, vector<4x16x16xf32>, vector<4x6x16xf32> -> vector<4x6x16xf32>
    "tpu.trace_stop"() : () -> ()
    "tpu.trace_start"() <{level = 10 : i32, message = "cow,cwv->cov"}> : () -> ()
    %cst_11 = arith.constant dense<0.000000e+00> : vector<4x6x6xf32>
    %13 = tpu.matmul %12, %9, %cst_11 {dimension_numbers = #tpu.dot_dimension_numbers<[2], [1], [1], [2], [0, 0, 0, 1, 1, 2], [0], [0]>} : vector<4x6x16xf32>, vector<4x16x6xf32>, vector<4x6x6xf32> -> vector<4x6x6xf32>
    "tpu.trace_stop"() : () -> ()
    %14 = arith.mulf %0, %0 : vector<4x16x16xf32>
    "tpu.trace_start"() <{level = 10 : i32, message = "coh,chw->cow"}> : () -> ()
    %cst_12 = arith.constant dense<0.000000e+00> : vector<4x6x16xf32>
    %15 = tpu.matmul %5, %14, %cst_12 {dimension_numbers = #tpu.dot_dimension_numbers<[2], [1], [1], [2], [0, 0, 0, 1, 1, 2], [0], [0]>} : vector<4x6x16xf32>, vector<4x16x16xf32>, vector<4x6x16xf32> -> vector<4x6x16xf32>
    "tpu.trace_stop"() : () -> ()
    "tpu.trace_start"() <{level = 10 : i32, message = "cow,cwv->cov"}> : () -> ()
    %cst_13 = arith.constant dense<0.000000e+00> : vector<4x6x6xf32>
    %16 = tpu.matmul %15, %9, %cst_13 {dimension_numbers = #tpu.dot_dimension_numbers<[2], [1], [1], [2], [0, 0, 0, 1, 1, 2], [0], [0]>} : vector<4x6x16xf32>, vector<4x16x6xf32>, vector<4x6x6xf32> -> vector<4x6x6xf32>
    "tpu.trace_stop"() : () -> ()
    %17 = arith.mulf %1, %1 : vector<4x16x16xf32>
    "tpu.trace_start"() <{level = 10 : i32, message = "coh,chw->cow"}> : () -> ()
    %cst_14 = arith.constant dense<0.000000e+00> : vector<4x6x16xf32>
    %18 = tpu.matmul %5, %17, %cst_14 {dimension_numbers = #tpu.dot_dimension_numbers<[2], [1], [1], [2], [0, 0, 0, 1, 1, 2], [0], [0]>} : vector<4x6x16xf32>, vector<4x16x16xf32>, vector<4x6x16xf32> -> vector<4x6x16xf32>
    "tpu.trace_stop"() : () -> ()
    "tpu.trace_start"() <{level = 10 : i32, message = "cow,cwv->cov"}> : () -> ()
    %cst_15 = arith.constant dense<0.000000e+00> : vector<4x6x6xf32>
    %19 = tpu.matmul %18, %9, %cst_15 {dimension_numbers = #tpu.dot_dimension_numbers<[2], [1], [1], [2], [0, 0, 0, 1, 1, 2], [0], [0]>} : vector<4x6x16xf32>, vector<4x16x6xf32>, vector<4x6x6xf32> -> vector<4x6x6xf32>
    "tpu.trace_stop"() : () -> ()
    %20 = arith.mulf %0, %1 : vector<4x16x16xf32>
    "tpu.trace_start"() <{level = 10 : i32, message = "coh,chw->cow"}> : () -> ()
    %cst_16 = arith.constant dense<0.000000e+00> : vector<4x6x16xf32>
    %21 = tpu.matmul %5, %20, %cst_16 {dimension_numbers = #tpu.dot_dimension_numbers<[2], [1], [1], [2], [0, 0, 0, 1, 1, 2], [0], [0]>} : vector<4x6x16xf32>, vector<4x16x16xf32>, vector<4x6x16xf32> -> vector<4x6x16xf32>
    "tpu.trace_stop"() : () -> ()
    "tpu.trace_start"() <{level = 10 : i32, message = "cow,cwv->cov"}> : () -> ()
    %cst_17 = arith.constant dense<0.000000e+00> : vector<4x6x6xf32>
    %22 = tpu.matmul %21, %9, %cst_17 {dimension_numbers = #tpu.dot_dimension_numbers<[2], [1], [1], [2], [0, 0, 0, 1, 1, 2], [0], [0]>} : vector<4x6x16xf32>, vector<4x16x6xf32>, vector<4x6x6xf32> -> vector<4x6x6xf32>
    "tpu.trace_stop"() : () -> ()
    %23 = arith.mulf %11, %11 : vector<4x6x6xf32>
    %24 = arith.mulf %13, %13 : vector<4x6x6xf32>
    %25 = arith.mulf %11, %13 : vector<4x6x6xf32>
    %26 = arith.subf %16, %23 : vector<4x6x6xf32>
    %27 = arith.subf %19, %24 : vector<4x6x6xf32>
    %28 = arith.subf %22, %25 : vector<4x6x6xf32>
    %cst_18 = arith.constant 2.000000e+00 : f32
    %29 = vector.broadcast %cst_18 : f32 to vector<4x6x6xf32>
    %30 = arith.mulf %29, %25 : vector<4x6x6xf32>
    %cst_19 = arith.constant 9.99999974E-5 : f32
    %31 = vector.broadcast %cst_19 : f32 to vector<4x6x6xf32>
    %32 = arith.addf %30, %31 : vector<4x6x6xf32>
    %cst_20 = arith.constant 2.000000e+00 : f32
    %33 = vector.broadcast %cst_20 : f32 to vector<4x6x6xf32>
    %34 = arith.mulf %33, %28 : vector<4x6x6xf32>
    %cst_21 = arith.constant 8.99999984E-4 : f32
    %35 = vector.broadcast %cst_21 : f32 to vector<4x6x6xf32>
    %36 = arith.addf %34, %35 : vector<4x6x6xf32>
    %37 = arith.mulf %32, %36 : vector<4x6x6xf32>
    %38 = arith.addf %23, %24 : vector<4x6x6xf32>
    %cst_22 = arith.constant 9.99999974E-5 : f32
    %39 = vector.broadcast %cst_22 : f32 to vector<4x6x6xf32>
    %40 = arith.addf %38, %39 : vector<4x6x6xf32>
    %41 = arith.addf %26, %27 : vector<4x6x6xf32>
    %cst_23 = arith.constant 8.99999984E-4 : f32
    %42 = vector.broadcast %cst_23 : f32 to vector<4x6x6xf32>
    %43 = arith.addf %41, %42 : vector<4x6x6xf32>
    %44 = arith.mulf %40, %43 : vector<4x6x6xf32>
    %45 = arith.divf %37, %44 : vector<4x6x6xf32>
    %c4_i32 = arith.constant 4 : i32
    %46 = arith.muli %arg0, %c4_i32 : i32
    %47 = tpu.iota {dimensions = array<i32: 0>} : vector<4x1x1xi32>
    %48 = vector.broadcast %46 : i32 to vector<4x1x1xi32>
    %49 = arith.addi %48, %47 : vector<4x1x1xi32>
    %c8_i32 = arith.constant 8 : i32
    %50 = vector.broadcast %c8_i32 : i32 to vector<4x1x1xi32>
    %51 = arith.cmpi slt, %49, %50 : vector<4x1x1xi32>
    %cst_24 = arith.constant 0.000000e+00 : f32
    %52 = vector.shape_cast %51 : vector<4x1x1xi1> to vector<4x1x1xi1>
    %53 = vector.broadcast %52 : vector<4x1x1xi1> to vector<4x6x6xi1>
    %54 = vector.broadcast %cst_24 : f32 to vector<4x6x6xf32>
    %55 = arith.select %53, %45, %54 : vector<4x6x6xi1>, vector<4x6x6xf32>
    %56 = vector.shape_cast %55 : vector<4x6x6xf32> to vector<1x4x6x6xf32>
    %cst_25 = arith.constant dense<0.000000e+00> : vector<1xf32>
    %57 = vector.multi_reduction <add>, %56, %cst_25 [1, 2, 3] : vector<1x4x6x6xf32> to vector<1xf32>
    %58 = vector.shape_cast %57 : vector<1xf32> to vector<1x1x1x1xf32>
    %59 = vector.extract %58[0, 0, 0, 0] : f32 from vector<1x1x1x1xf32>
    %60 = tpu.iota {dimensions = array<i32: 2>} : vector<1x1x128xi32>
    %c0_i32 = arith.constant 0 : i32
    %61 = vector.broadcast %c0_i32 : i32 to vector<1x1x128xi32>
    %62 = arith.cmpi eq, %60, %61 : vector<1x1x128xi32>
    %cst_26 = arith.constant 0.000000e+00 : f32
    %63 = vector.broadcast %59 : f32 to vector<1x1x128xf32>
    %64 = vector.broadcast %cst_26 : f32 to vector<1x1x128xf32>
    %65 = arith.select %62, %63, %64 : vector<1x1x128xi1>, vector<1x1x128xf32>
    %c0_27 = arith.constant 0 : index
    %c0_28 = arith.constant 0 : index
    %c0_29 = arith.constant 0 : index
    %66 = vector.load %arg5[%c0_27, %c0_28, %c0_29] : memref<1x1x128xf32, #tpu.memory_space<vmem>>, vector<1x1x128xf32>
    tpu.vector_store %arg5[%c0_27, %c0_28, %c0_29], %65 {strides = array<i32>} : memref<1x1x128xf32, #tpu.memory_space<vmem>>, vector<1x1x128xf32>,
    return
  }
  func.func @transform_0(%arg0: i32) -> (i32, i32, i32) {
    %c0_i32 = arith.constant 0 : i32
    %c0_i32_0 = arith.constant 0 : i32
    %c0_i32_1 = arith.constant 0 : i32
    return %arg0, %c0_i32, %c0_i32_0 : i32, i32, i32
  }
  func.func @transform_1(%arg0: i32) -> (i32, i32, i32) {
    %c0_i32 = arith.constant 0 : i32
    %c0_i32_0 = arith.constant 0 : i32
    %c0_i32_1 = arith.constant 0 : i32
    return %arg0, %c0_i32, %c0_i32_0 : i32, i32, i32
  }
  func.func @transform_2(%arg0: i32) -> (i32, i32) {
    %c0_i32 = arith.constant 0 : i32
    %c0_i32_0 = arith.constant 0 : i32
    %c0_i32_1 = arith.constant 0 : i32
    return %c0_i32, %c0_i32_0 : i32, i32
  }
  func.func @transform_3(%arg0: i32) -> (i32, i32) {
    %c0_i32 = arith.constant 0 : i32
    %c0_i32_0 = arith.constant 0 : i32
    %c0_i32_1 = arith.constant 0 : i32
    return %c0_i32, %c0_i32_0 : i32, i32
  }
  func.func @transform_4(%arg0: i32) -> (i32, i32, i32) {
    %c0_i32 = arith.constant 0 : i32
    %c0_i32_0 = arith.constant 0 : i32
    %c0_i32_1 = arith.constant 0 : i32
    return %arg0, %c0_i32, %c0_i32_0 : i32, i32, i32
  }
}

</mosaic_0001>

<bundles_post_ra>
// kernel: ssim_loss.1
= control target key start
LH: loop header
LB: loop body
LE: loop exit
PB: predicated region body
PF: predicated region fallthrough
CT: control target
= control target key end

     0   :  { %9 = vsyncpa [#allocation3], 0  ;;  %s4718_s0 = inlined_call_operand.hbm [shape: f32[8,16,16], index: 0, kind: input, shape index: {}]   ;;  %s4719_s1 = inlined_call_operand.hbm [shape: f32[8,16,16], index: 1, kind: input, shape index: {}]   ;;  %s4720_s2 = inlined_call_operand.vmem [shape: f32[6,16], index: 2, kind: input, shape index: {}]   ;;  %s4721_s3 = inlined_call_operand.vmem [shape: f32[16,6], index: 3, kind: input, shape index: {}]   ;;  %s4722_s4 = inlined_call_operand.vmem [shape: f32[2,1,128], index: 4, kind: output, shape index: {}]  }
   0x1   :  { %11 = vsyncpa [#allocation3 + $0x1], 0 }
   0x2   :  { %12 = vsyncpa [#allocation5], 0 }
   0x3   :  { %14 = vsyncpa [#allocation5 + $0x1], 0  ;;  %s4135_s15 = smov 0   ;;  %s4137_s16 = smov 0  }
   0x4   :  { %s4139_s17 = smov 0   ;;  %s4141_s18 = smov 0  }
   0x5 LB: > { %s4154_s19 = sadd.s32 4294967295, %s4101_s18   ;;  %s4157_s20 = sadd.s32 1, %s4101_s18   ;;  %s4101_s18 = sphi %s4141_s18, %s4732_s18   ;;  %s4097_s17 = sphi %s4139_s17, %s4731_s17   ;;  %s4093_s16 = sphi %s4137_s16, %s4730_s16   ;;  %s4089_s15 = sphi %s4135_s15, %s4729_s15  }
   0x6   : > { %s24_s21 = ssub.s32 %s4101_s18, %s4157_s20  ;;  %s27_s22 = sadd.s32 1, %s4097_s17 }
   0x7   : > { %p25_p0 = scmp.eq.s32.totalorder %s24_s21, 0  ;;  %p34_p1 = scmp.ne.s32.totalorder %s4097_s17, %s4093_s16 }
   0x8   : > { %p35_p2 = scmp.eq.s32.totalorder %s4101_s18, 0  ;;  %p40_p3 = scmp.ne.s32.totalorder %s4093_s16, %s4089_s15 }
   0x9   : > { %s4167_s23 = scalar_select %p25_p0, %s4097_s17, %s27_s22  }
   0xa   : > { %p36_p4 = por %p35_p2, %p34_p1  ;;  %p41_p5 = scmp.eq.s32.totalorder %s4154_s19, 0 }
   0xb   : > { %p3957_p6 = scmp.lt.s32.totalorder %s4101_s18, 2  ;;  %s4176_s25 = sand.u32 1, %s4097_s17  }
   0xc   : > { %p4171_p7 = por %p41_p5, %p40_p3  ;;  %s3366_s26 = sshll.u32 %s4176_s25, 6 }
   0xd   : > { %s3421_s27 = sshll.u32 %s4101_s18, 10  ;;  %s168_s5 = scalar_lea.vmem [#allocation2], %s3366_s26 }
   0xe   : > { %s4724_s24 = scalar_select %p4171_p7, 1, 0 }
   0xf   : > { %s4185_s30 = scalar_lea.hbm %s4718_s0, %s3421_s27  ;;  %s176_s6 = sshll.u32 %s168_s5, 4  ;;  %s4189_s6 = int_to_ptr.vmem [resolvable:$true] %s176_s6 }
  0x10   : > { %p4191_p8 = pnand %p3957_p6, %p36_p4  ;;  %s165_s8 = scalar_lea.sflag [#allocation3], %s4176_s25 }
  0x11   : > { %s4003_s9 = scalar_lea.hbm %s4185_s30, 1024  ;;  %s4008_s12 = scalar_lea.hbm %s4718_s0, 2048 }
  0x12   : > { %p4004_p10 = scmp.ne.s32.totalorder %s4185_s30, %s4003_s9  ;;  %p4005_p11 = pneg %p4191_p8 }
  0x13   : > { %p4009_p0 = scmp.lt.u32.totalorder %s4185_s30, %s4718_s0  ;;  %p4010_p1 = scmp.lt.u32.totalorder %s4008_s12, %s4003_s9 }
  0x14   : > { %p4006_p12 = pnand %p4005_p11, %p4004_p10  ;;  %p4012_p3 = scmp.lt.u32.totalorder %s4003_s9, %s4185_s30 }
  0x15   : > { %p4011_p2 = por %p4010_p1, %p4009_p0 }
  0x16   : > { %p4007_p13 = pneg %p4006_p12 }
  0x17   : > { %p4013_p4 = por %p4012_p3, %p4011_p2 }
  0x19   : > { %p4014_p5 = pnand %p4013_p4, %p4007_p13 }
  0x1b   : > { %4017 = shalt.err (!%p4014_p5)
}
  0x1c   : > { %s4018_s15 = scalar_lea.vmem %s4189_s6, 1024  ;;  %s4103_s21 = smov [#allocation2]  }
  0x1d   : > { %p4019_p6 = scmp.ne.s32.totalorder %s4189_s6, %s4018_s15  ;;  %s4023_s22 = sshll.u32 %s4103_s21, 4  ;;  %s4024_s22 = int_to_ptr.vmem [resolvable:$false] %s4023_s22 }
  0x1e   : > { %s4025_s28 = scalar_lea.vmem %s4024_s22, 2048  ;;  %p4026_p9 = scmp.lt.s32.totalorder %s4189_s6, %s4024_s22 }
  0x1f   : > { %p4021_p10 = pnand %p4019_p6, %p4005_p11  ;;  %p4027_p0 = scmp.lt.s32.totalorder %s4025_s28, %s4018_s15 }
  0x21   : > { %p4022_p12 = pneg %p4021_p10  ;;  %p4028_p1 = por %p4027_p0, %p4026_p9 }
  0x23   : > { %p4029_p2 = pnand %p4028_p1, %p4022_p12 }
  0x25   : > { %4032 = shalt.err (!%p4029_p2)
}
  0x26   : > { %s4104_s29 = smov 128   ;;  %s4105_s5 = smov 8  }
  0x27   : > { %3953 = dma.hbm_to_vmem [thread:$0]  (!%p4191_p8), %s4185_s30, 1024, %s4189_s6, %s165_s8, %s4104_s29, %s4104_s29, %s4105_s5  }
  0x28   : > { %p206_p9 = scmp.lt.s32.totalorder %s4101_s18, 3  ;;  %s4233_s11 = scalar_lea.hbm %s4719_s1, %s3421_s27 }
  0x29   : > { %p4726_p13 = scmp.ge.s32.totalorder %s4101_s18, 1  ;;  %s190_s13 = scalar_lea.vmem [#allocation4], %s3366_s26 }
  0x2a   : > { %s198_s14 = sshll.u32 %s190_s13, 4  ;;  %s187_s30 = scalar_lea.sflag [#allocation5], %s4176_s25  ;;  %s4243_s14 = int_to_ptr.vmem [resolvable:$true] %s198_s14 }
  0x2b   : > { %p4237_p3 = pnand %p4726_p13, %p206_p9  ;;  %s4033_s6 = scalar_lea.hbm %s4233_s11, 1024 }
  0x2c   : > { %p4034_p4 = scmp.ne.s32.totalorder %s4233_s11, %s4033_s6  ;;  %s4038_s8 = scalar_lea.hbm %s4719_s1, 2048 }
  0x2d   : > { %p4039_p10 = scmp.lt.u32.totalorder %s4233_s11, %s4719_s1  ;;  %p4040_p12 = scmp.lt.u32.totalorder %s4038_s8, %s4033_s6 }
  0x2e   : > { %p4036_p5 = pnand %p4034_p4, %p4005_p11  ;;  %p4042_p1 = scmp.lt.u32.totalorder %s4033_s6, %s4233_s11 }
  0x2f   : > { %p4041_p0 = por %p4040_p12, %p4039_p10 }
  0x30   : > { %p4037_p6 = pneg %p4036_p5 }
  0x31   : > { %p4043_p2 = por %p4042_p1, %p4041_p0 }
  0x33   : > { %p4044_p9 = pnand %p4043_p2, %p4037_p6 }
  0x35   : > { %4047 = shalt.err (!%p4044_p9)
}
  0x36   : > { %s4048_s26 = scalar_lea.vmem %s4243_s14, 1024  ;;  %s4106_s22 = smov [#allocation4]  }
  0x37   : > { %p4049_p13 = scmp.ne.s32.totalorder %s4243_s14, %s4048_s26  ;;  %s4053_s28 = sshll.u32 %s4106_s22, 4  ;;  %s4054_s28 = int_to_ptr.vmem [resolvable:$false] %s4053_s28 }
  0x38   : > { %s4055_s9 = scalar_lea.vmem %s4054_s28, 2048  ;;  %p4056_p7 = scmp.lt.s32.totalorder %s4243_s14, %s4054_s28 }
  0x39   : > { %p4051_p4 = pnand %p4049_p13, %p4005_p11  ;;  %p4057_p10 = scmp.lt.s32.totalorder %s4055_s9, %s4048_s26 }
  0x3b   : > { %p4052_p5 = pneg %p4051_p4  ;;  %p4058_p12 = por %p4057_p10, %p4056_p7 }
  0x3d   : > { %p4059_p0 = pnand %p4058_p12, %p4052_p5 }
  0x3f   : > { %4062 = shalt.err (!%p4059_p0)
}
  0x40   : > { %3956 = dma.hbm_to_vmem [thread:$0]  (!%p4191_p8), %s4233_s11, 1024, %s4243_s14, %s187_s30, %s4104_s29, %s4104_s29, %s4105_s5  }
  0x41   : > { %210 = sbr.rel (%p4237_p3) target bundleno = 1612 (0x64c), region = 36  ;;  %s212_s10 = sand.u32 (!%p4237_p3), 1, %s4093_s16  }
  0x42   : > { %s3375_s13 = sshll.u32 (!%p4237_p3), %s212_s10, 6  ;;  %s213_s6 = scalar_lea.sflag (!%p4237_p3), [#allocation3], %s212_s10 }
  0x43   : > { %s216_s18 = scalar_lea.vmem (!%p4237_p3), [#allocation2], %s3375_s13  ;;  %p4728_p7 = scmp.ne.s32.totalorder (!%p4237_p3), %s4724_s24, 0 }
  0x48   : > { %4080 = dma.done.wait (%p4728_p7), %s213_s6, 1024  }
  0x49   : > { %4082 = vsyncadd (%p4728_p7), %s213_s6, 4294966272  ;;  %s222_s7 = scalar_lea.sflag [#allocation5], %s212_s10  ;;  %s4281_s25 = scalar_lea.vmem [#allocation4], %s3375_s13 }
  0x4a   : > { %4084 = dma.done.wait (%p4728_p7), %s222_s7, 1024  }
  0x4b   : > { %4086 = vsyncadd (%p4728_p7), %s222_s7, 4294966272  ;;  %v4107_v0 = vmov 0.0|0.0   ;;  %vm4108_vm0 = vmmov 0   ;;  %v4109_v1 = vmov 0.0   ;;  %v4293_v2 = vld [vmem:[%s216_s18] sm:$0xff]  ;;  %v4295_v3 = vld [vmem:[%s216_s18 + $0x8] sm:$0xff] }
  0x4c   : > { %3824 = vmatprep.subr.bf16.mxu0 %v4107_v0  ;;  %3827 = vmatprep.subr.bf16.mxu1 %v4107_v0  ;;  %v3825_v4 = vpack.c.bf16 %v4295_v3, %v4293_v2  ;;  %v4299_v5 = vld [vmem:[%s216_s18 + $0x10] sm:$0xff]  ;;  %v4301_v6 = vld [vmem:[%s216_s18 + $0x18] sm:$0xff]  ;;  %v4308_v8 = vld [vmem:[%s4720_s2] sm:$0x3f]  ;;  %vm277_vm1 = vcmask 130048   ;;  %v1425_v38 = vmul.f32 %v4293_v2, %v4293_v2  ;;  %v1426_v39 = vmul.f32 %v4295_v3, %v4295_v3  ;;  %s3417_s30 = sshll.u32 %s4154_s19, 2 }
  0x4d   : > { %3548 = vmatprep.mubr.msk.f32.mxu0 %vm4108_vm0, %v4109_v1  ;;  %3555 = vmatprep.mubr.msk.f32.mxu1 %vm4108_vm0, %v4109_v1  ;;  %v3828_v7 = vpack.c.bf16 %v4301_v6, %v4299_v5  ;;  %v4310_v9 = vld [vmem:[%s216_s18 + $0x20] sm:$0xff]  ;;  %v4312_v10 = vld [vmem:[%s216_s18 + $0x28] sm:$0xff]  ;;  %v4314_v11 = vld [vmem:[%s216_s18 + $0x30] sm:$0xff]  ;;  %v1427_v40 = vmul.f32 %v4299_v5, %v4299_v5  ;;  %v1428_v41 = vmul.f32 %v4301_v6, %v4301_v6  ;;  %vm3258_vm4 = vcmask 46080   ;;  %p255_p8 = scmp.lt.s32.totalorder %s4154_s19, 1 }
  0x4e   : > { %3826 = vmatpush3.bf16.msra.mxu0 %v3825_v4  ;;  %v3831_v12 = vpack.c.bf16 %v4312_v10, %v4310_v9  ;;  %v4319_v13 = vld [vmem:[%s216_s18 + $0x38] sm:$0xff]  ;;  %v275_v14 = vld [vmem:[%s4721_s3] sm:$0xff]  ;;  %v276_v15 = vld [vmem:[%s4721_s3 + $0x8] sm:$0xff]  ;;  %v3873_v42 = vpack.c.bf16 %v1426_v39, %v1425_v38  ;;  %v1429_v56 = vmul.f32 %v4310_v9, %v4310_v9  ;;  %v1430_v57 = vmul.f32 %v4312_v10, %v4312_v10 }
  0x4f   : > { %3829 = vmatpush3.bf16.msra.mxu1 %v3828_v7  ;;  %3830 = vmatprep.subr.bf16.mxu0 %v4107_v0  ;;  %v3834_v16 = vpack.c.bf16 %v4319_v13, %v4314_v11  ;;  %v4334_v17 = vpack.c.bf16 %v276_v15, %v275_v14  ;;  %v4355_v18 = vld [vmem:[%s4281_s25] sm:$0xff]  ;;  %v4358_v19 = vld [vmem:[%s4281_s25 + $0x8] sm:$0xff]  ;;  %v4361_v20 = vld [vmem:[%s4281_s25 + $0x10] sm:$0xff]  ;;  %v3876_v43 = vpack.c.bf16 %v1428_v41, %v1427_v40  ;;  %s4734_s19 = smov (!%p255_p8, %s4154_s19), 1 }
  0x50   : > { %3833 = vmatprep.subr.bf16.mxu1 %v4107_v0  ;;  %v4364_v21 = vld [vmem:[%s4281_s25 + $0x18] sm:$0xff]  ;;  %v3849_v26 = vpack.c.bf16 %v4358_v19, %v4355_v18  ;;  %v4377_v28 = vld [vmem:[%s4281_s25 + $0x20] sm:$0xff]  ;;  %v4380_v29 = vld [vmem:[%s4281_s25 + $0x28] sm:$0xff]  ;;  %v1431_v58 = vmul.f32 %v4314_v11, %v4314_v11  ;;  %v1432_v59 = vmul.f32 %v4319_v13, %v4319_v13  ;;  %v3879_v4 = vpack.c.bf16 %v1430_v57, %v1429_v56  ;;  %s257_s15 = scalar_lea.vmem %s4722_s4, %s4734_s19 }
  0x51   : > { %3549 = vmatmul.mubr.msk.f32.vlgmr.msra.gmra.mrb[0].mxu0 %vm277_vm1, %v4308_v8  ;;  %v3852_v27 = vpack.c.bf16 %v4364_v21, %v4361_v20  ;;  %v4386_v31 = vld [vmem:[%s4281_s25 + $0x30] sm:$0xff]  ;;  %v4389_v32 = vld [vmem:[%s4281_s25 + $0x38] sm:$0xff]  ;;  %v3855_v36 = vpack.c.bf16 %v4380_v29, %v4377_v28  ;;  %v2010_v56 = vmul.f32 %v4380_v29, %v4380_v29 }
  0x52   : > { %3556 = vmatmul.mubr.msk.f32.vlgmr.msra.gmra.mrb[0].mxu1 %vm277_vm1, %v4308_v8  ;;  %3832 = vmatpush3.bf16.msra.mxu0 %v3831_v12  ;;  %v3858_v37 = vpack.c.bf16 %v4389_v32, %v4386_v31  ;;  %v3882_v7 = vpack.c.bf16 %v1432_v59, %v1431_v58  ;;  %v2011_v58 = vmul.f32 %v4386_v31, %v4386_v31 }
  0x53   : > { %3835 = vmatpush3.bf16.msra.mxu1 %v3834_v16  ;;  %3562 = vmatprep.mubr.msk.f32.mxu0 %vm4108_vm0, %v4109_v1  ;;  %v2012_v59 = vmul.f32 %v4389_v32, %v4389_v32 }
  0x54   : > { %3569 = vmatprep.mubr.msk.f32.mxu1 %vm4108_vm0, %v4109_v1  ;;  %3836 = vmatprep.subr.bf16.mxu0 %v4107_v0 }
  0x55   : > { %3563 = vmatmul.mubr.msk.f32.vlgmr.msra.gmra.mrb[2].mxu0 %vm277_vm1, %v4308_v8  ;;  %3839 = vmatprep.subr.bf16.mxu1 %v4107_v0 }
  0x56   : > { %3570 = vmatmul.mubr.msk.f32.vlgmr.msra.gmra.mrb[2].mxu1 %vm277_vm1, %v4308_v8  ;;  %3838 = vmatpush3.bf16.msra.mxu0 %v4334_v17 }
  0x57   : > { %3841 = vmatpush3.bf16.msra.mxu1 %v4334_v17  ;;  %3576 = vmatprep.mubr.msk.f32.mxu0 %vm4108_vm0, %v4109_v1 }
  0x58   : > { %3583 = vmatprep.mubr.msk.f32.mxu1 %vm4108_vm0, %v4109_v1  ;;  %3842 = vmatprep.subr.bf16.mxu0 %v4107_v0 }
  0x59   : > { %3845 = vmatprep.subr.bf16.mxu1 %v4107_v0 }
 0x124   : > { %v347_v22 = vpop.f32.mrb[0].mxu0 }
 0x125   : > { %v417_v23 = vpop.f32.mrb[0].mxu1  ;;  %v3550_v24 = vpop.f32.mrb[1].mxu0  ;;  %3577 = vmatmul.mubr.msk.f32.vlgmr.msra.gmra.mrb[4].mxu0 %vm277_vm1, %v347_v22 }
 0x126   : > { %3584 = vmatmul.mubr.msk.f32.vlgmr.msra.gmra.mrb[4].mxu1 %vm277_vm1, %v417_v23  ;;  %3844 = vmatpush3.bf16.msra.mxu0 %v4334_v17  ;;  %v3557_v25 = vpop.f32.mrb[1].mxu1 }
 0x127   : > { %3847 = vmatpush3.bf16.msra.mxu1 %v4334_v17  ;;  %3590 = vmatprep.mubr.msk.f32.mxu0 %vm4108_vm0, %v4109_v1 }
 0x128   : > { %v487_v30 = vpop.f32.mrb[2].mxu0  ;;  %3597 = vmatprep.mubr.msk.f32.mxu1 %vm4108_vm0, %v4109_v1  ;;  %3848 = vmatprep.subr.bf16.mxu0 %v4107_v0 }
 0x129   : > { %v557_v33 = vpop.f32.mrb[2].mxu1  ;;  %v3564_v34 = vpop.f32.mrb[3].mxu0  ;;  %3591 = vmatmul.mubr.msk.f32.vlgmr.msra.gmra.mrb[6].mxu0 %vm277_vm1, %v487_v30  ;;  %3851 = vmatprep.subr.bf16.mxu1 %v4107_v0 }
 0x12a   : > { %3598 = vmatmul.mubr.msk.f32.vlgmr.msra.gmra.mrb[6].mxu1 %vm277_vm1, %v557_v33  ;;  %3850 = vmatpush3.bf16.msra.mxu0 %v3849_v26  ;;  %v3571_v35 = vpop.f32.mrb[3].mxu1 }
 0x12b   : > { %3853 = vmatpush3.bf16.msra.mxu1 %v3852_v27  ;;  %3604 = vmatprep.mubr.msk.f32.mxu0 %vm4108_vm0, %v4109_v1 }
 0x12c   : > { %3611 = vmatprep.mubr.msk.f32.mxu1 %vm4108_vm0, %v4109_v1  ;;  %3854 = vmatprep.subr.bf16.mxu0 %v4107_v0 }
 0x12d   : > { %3605 = vmatmul.mubr.msk.f32.vlgmr.msra.gmra.mrb[8].mxu0 %vm277_vm1, %v4308_v8  ;;  %3857 = vmatprep.subr.bf16.mxu1 %v4107_v0 }
 0x12e   : > { %3612 = vmatmul.mubr.msk.f32.vlgmr.msra.gmra.mrb[8].mxu1 %vm277_vm1, %v4308_v8  ;;  %3856 = vmatpush3.bf16.msra.mxu0 %v3855_v36 }
 0x12f   : > { %3859 = vmatpush3.bf16.msra.mxu1 %v3858_v37  ;;  %3618 = vmatprep.mubr.msk.f32.mxu0 %vm4108_vm0, %v4109_v1 }
 0x130   : > { %3625 = vmatprep.mubr.msk.f32.mxu1 %vm4108_vm0, %v4109_v1  ;;  %3860 = vmatprep.subr.bf16.mxu0 %v4107_v0 }
 0x131   : > { %3619 = vmatmul.mubr.msk.f32.vlgmr.msra.gmra.mrb[10].mxu0 %vm277_vm1, %v4308_v8  ;;  %3863 = vmatprep.subr.bf16.mxu1 %v4107_v0 }
 0x132   : > { %3626 = vmatmul.mubr.msk.f32.vlgmr.msra.gmra.mrb[10].mxu1 %vm277_vm1, %v4308_v8  ;;  %3862 = vmatpush3.bf16.msra.mxu0 %v4334_v17 }
 0x133   : > { %3865 = vmatpush3.bf16.msra.mxu1 %v4334_v17  ;;  %3632 = vmatprep.mubr.msk.f32.mxu0 %vm4108_vm0, %v4109_v1 }
 0x134   : > { %3639 = vmatprep.mubr.msk.f32.mxu1 %vm4108_vm0, %v4109_v1  ;;  %3866 = vmatprep.subr.bf16.mxu0 %v4107_v0 }
 0x135   : > { %3869 = vmatprep.subr.bf16.mxu1 %v4107_v0 }
 0x1f8   : > { %v630_v44 = vpop.f32.mrb[4].mxu0 }
 0x1f9   : > { %v3578_v45 = vpop.f32.mrb[5].mxu0  ;;  %v703_v46 = vpop.f32.mrb[4].mxu1  ;;  %v4486_v14 = vmul.f32 %v630_v44, %v630_v44 }
 0x1fa   : > { %v3585_v47 = vpop.f32.mrb[5].mxu1  ;;  %v4492_v24 = vmul.f32 %v703_v46, %v703_v46  ;;  %v2006_v45 = vmul.f32 %v4358_v19, %v4358_v19 }
 0x1fb   : > { %v2007_v47 = vmul.f32 %v4361_v20, %v4361_v20 }
 0x1fc   : > { %v4434_v48 = vpop.f32.mrb[6].mxu0 }
 0x1fd   : > { %v3592_v49 = vpop.f32.mrb[7].mxu0  ;;  %v4436_v50 = vpop.f32.mrb[6].mxu1  ;;  %v4508_v35 = vmul.f32 %v4434_v48, %v4434_v48 }
 0x1fe   : > { %v3599_v51 = vpop.f32.mrb[7].mxu1  ;;  %v4512_v36 = vmul.f32 %v4436_v50, %v4436_v50 }
 0x200   : > { %v919_v52 = vpop.f32.mrb[8].mxu0 }
 0x201   : > { %v989_v53 = vpop.f32.mrb[8].mxu1  ;;  %v3606_v54 = vpop.f32.mrb[9].mxu0  ;;  %3633 = vmatmul.mubr.msk.f32.vlgmr.msra.gmra.mrb[12].mxu0 %vm277_vm1, %v919_v52 }
 0x202   : > { %3640 = vmatmul.mubr.msk.f32.vlgmr.msra.gmra.mrb[12].mxu1 %vm277_vm1, %v989_v53  ;;  %3868 = vmatpush3.bf16.msra.mxu0 %v4334_v17  ;;  %v3613_v55 = vpop.f32.mrb[9].mxu1 }
 0x203   : > { %3871 = vmatpush3.bf16.msra.mxu1 %v4334_v17  ;;  %3646 = vmatprep.mubr.msk.f32.mxu0 %vm4108_vm0, %v4109_v1  ;;  %v2009_v55 = vmul.f32 %v4377_v28, %v4377_v28 }
 0x204   : > { %v1059_v60 = vpop.f32.mrb[10].mxu0  ;;  %3653 = vmatprep.mubr.msk.f32.mxu1 %vm4108_vm0, %v4109_v1  ;;  %3872 = vmatprep.subr.bf16.mxu0 %v4107_v0 }
 0x205   : > { %v1129_v61 = vpop.f32.mrb[10].mxu1  ;;  %v3620_v62 = vpop.f32.mrb[11].mxu0  ;;  %3647 = vmatmul.mubr.msk.f32.vlgmr.msra.gmra.mrb[14].mxu0 %vm277_vm1, %v1059_v60  ;;  %3875 = vmatprep.subr.bf16.mxu1 %v4107_v0 }
 0x206   : > { %3654 = vmatmul.mubr.msk.f32.vlgmr.msra.gmra.mrb[14].mxu1 %vm277_vm1, %v1129_v61  ;;  %3874 = vmatpush3.bf16.msra.mxu0 %v3873_v42  ;;  %v3627_v63 = vpop.f32.mrb[11].mxu1 }
 0x207   : > { %3877 = vmatpush3.bf16.msra.mxu1 %v3876_v43  ;;  %3660 = vmatprep.mubr.msk.f32.mxu0 %vm4108_vm0, %v4109_v1 }
 0x208   : > { %3667 = vmatprep.mubr.msk.f32.mxu1 %vm4108_vm0, %v4109_v1  ;;  %3878 = vmatprep.subr.bf16.mxu0 %v4107_v0 }
 0x209   : > { %3661 = vmatmul.mubr.msk.f32.vlgmr.msra.gmra.mrb[16].mxu0 %vm277_vm1, %v4308_v8  ;;  %3881 = vmatprep.subr.bf16.mxu1 %v4107_v0 }
 0x20a   : > { %3668 = vmatmul.mubr.msk.f32.vlgmr.msra.gmra.mrb[16].mxu1 %vm277_vm1, %v4308_v8  ;;  %3880 = vmatpush3.bf16.msra.mxu0 %v3879_v4  ;;  %v3903_v4 = vpack.c.bf16 %v2010_v56, %v2009_v55 }
 0x20b   : > { %3883 = vmatpush3.bf16.msra.mxu1 %v3882_v7  ;;  %3674 = vmatprep.mubr.msk.f32.mxu0 %vm4108_vm0, %v4109_v1  ;;  %v3906_v7 = vpack.c.bf16 %v2012_v59, %v2011_v58 }
 0x20c   : > { %3681 = vmatprep.mubr.msk.f32.mxu1 %vm4108_vm0, %v4109_v1  ;;  %3884 = vmatprep.subr.bf16.mxu0 %v4107_v0 }
 0x20d   : > { %3675 = vmatmul.mubr.msk.f32.vlgmr.msra.gmra.mrb[18].mxu0 %vm277_vm1, %v4308_v8  ;;  %3887 = vmatprep.subr.bf16.mxu1 %v4107_v0 }
 0x20e   : > { %3682 = vmatmul.mubr.msk.f32.vlgmr.msra.gmra.mrb[18].mxu1 %vm277_vm1, %v4308_v8  ;;  %3886 = vmatpush3.bf16.msra.mxu0 %v4334_v17 }
 0x20f   : > { %3889 = vmatpush3.bf16.msra.mxu1 %v4334_v17  ;;  %3688 = vmatprep.mubr.msk.f32.mxu0 %vm4108_vm0, %v4109_v1 }
 0x210   : > { %3695 = vmatprep.mubr.msk.f32.mxu1 %vm4108_vm0, %v4109_v1  ;;  %3890 = vmatprep.subr.bf16.mxu0 %v4107_v0 }
 0x211   : > { %3893 = vmatprep.subr.bf16.mxu1 %v4107_v0 }
 0x2d4   : > { %v1202_v12 = vpop.f32.mrb[12].mxu0 }
 0x2d5   : > { %v4488_v15 = vmul.f32 %v1202_v12, %v1202_v12  ;;  %v4490_v16 = vmul.f32 %v1202_v12, %v630_v44  ;;  %v1275_v22 = vpop.f32.mrb[12].mxu1  ;;  %v3634_v23 = vpop.f32.mrb[13].mxu0  ;;  %v2005_v44 = vmul.f32 %v4355_v18, %v4355_v18  ;;  %v2585_v12 = vmul.f32 %v4355_v18, %v4293_v2 }
 0x2d6   : > { %v4494_v25 = vmul.f32 %v1275_v22, %v1275_v22  ;;  %v4496_v26 = vmul.f32 %v1275_v22, %v703_v46  ;;  %v3641_v27 = vpop.f32.mrb[13].mxu1  ;;  %v2586_v22 = vmul.f32 %v4358_v19, %v4295_v3  ;;  %v2587_v23 = vmul.f32 %v4361_v20, %v4299_v5 }
 0x2d7   : > { %v4500_v30 = vadd.f32 %v4488_v15, %v4486_v14  ;;  %v3897_v54 = vpack.c.bf16 %v2006_v45, %v2005_v44  ;;  %v2588_v27 = vmul.f32 %v4364_v21, %v4301_v6 }
 0x2d8   : > { %v4504_v33 = vadd.f32 %v4494_v25, %v4492_v24  ;;  %v1348_v34 = vpop.f32.mrb[14].mxu0 }
 0x2d9   : > { %v4514_v37 = vmul.f32 %v1348_v34, %v1348_v34  ;;  %v4517_v38 = vmul.f32 %v1348_v34, %v4434_v48  ;;  %v1421_v39 = vpop.f32.mrb[14].mxu1  ;;  %v3648_v40 = vpop.f32.mrb[15].mxu0  ;;  %v2008_v48 = vmul.f32 %v4364_v21, %v4364_v21  ;;  %v3921_v34 = vpack.c.bf16 %v2586_v22, %v2585_v12 }
 0x2da   : > { %v4519_v41 = vmul.f32 %v1421_v39, %v1421_v39  ;;  %v4522_v42 = vmul.f32 %v1421_v39, %v4436_v50  ;;  %v3655_v43 = vpop.f32.mrb[15].mxu1  ;;  %v3924_v39 = vpack.c.bf16 %v2588_v27, %v2587_v23 }
 0x2db   : > { %v4530_v46 = vadd.f32 %v4514_v37, %v4508_v35  ;;  %v3900_v57 = vpack.c.bf16 %v2008_v48, %v2007_v47 }
 0x2dc   : > { %v4538_v49 = vadd.f32 %v4519_v41, %v4512_v36  ;;  %v1499_v50 = vpop.f32.mrb[16].mxu0 }
 0x2dd   : > { %v1569_v51 = vpop.f32.mrb[16].mxu1  ;;  %v3662_v52 = vpop.f32.mrb[17].mxu0  ;;  %3689 = vmatmul.mubr.msk.f32.vlgmr.msra.gmra.mrb[20].mxu0 %vm277_vm1, %v1499_v50 }
 0x2de   : > { %3696 = vmatmul.mubr.msk.f32.vlgmr.msra.gmra.mrb[20].mxu1 %vm277_vm1, %v1569_v51  ;;  %3892 = vmatpush3.bf16.msra.mxu0 %v4334_v17  ;;  %v3669_v53 = vpop.f32.mrb[17].mxu1  ;;  %v2589_v51 = vmul.f32 %v4377_v28, %v4310_v9  ;;  %v2590_v52 = vmul.f32 %v4380_v29, %v4312_v10 }
 0x2df   : > { %3895 = vmatpush3.bf16.msra.mxu1 %v4334_v17  ;;  %3702 = vmatprep.mubr.msk.f32.mxu0 %vm4108_vm0, %v4109_v1  ;;  %v2591_v53 = vmul.f32 %v4386_v31, %v4314_v11 }
 0x2e0   : > { %v1639_v60 = vpop.f32.mrb[18].mxu0  ;;  %3709 = vmatprep.mubr.msk.f32.mxu1 %vm4108_vm0, %v4109_v1  ;;  %3896 = vmatprep.subr.bf16.mxu0 %v4107_v0  ;;  %v3927_v11 = vpack.c.bf16 %v2590_v52, %v2589_v51 }
 0x2e1   : > { %v1709_v61 = vpop.f32.mrb[18].mxu1  ;;  %v3676_v62 = vpop.f32.mrb[19].mxu0  ;;  %3703 = vmatmul.mubr.msk.f32.vlgmr.msra.gmra.mrb[22].mxu0 %vm277_vm1, %v1639_v60  ;;  %3899 = vmatprep.subr.bf16.mxu1 %v4107_v0 }
 0x2e2   : > { %3710 = vmatmul.mubr.msk.f32.vlgmr.msra.gmra.mrb[22].mxu1 %vm277_vm1, %v1709_v61  ;;  %3898 = vmatpush3.bf16.msra.mxu0 %v3897_v54  ;;  %v3683_v63 = vpop.f32.mrb[19].mxu1  ;;  %v2592_v54 = vmul.f32 %v4389_v32, %v4319_v13  ;;  %v3213_v61 = vadd.f32 0.0001, %v4500_v30 }
 0x2e3   : > { %3901 = vmatpush3.bf16.msra.mxu1 %v3900_v57  ;;  %3716 = vmatprep.mubr.msk.f32.mxu0 %vm4108_vm0, %v4109_v1 }
 0x2e4   : > { %3723 = vmatprep.mubr.msk.f32.mxu1 %vm4108_vm0, %v4109_v1  ;;  %3902 = vmatprep.subr.bf16.mxu0 %v4107_v0  ;;  %v3930_v13 = vpack.c.bf16 %v2592_v54, %v2591_v53 }
 0x2e5   : > { %3717 = vmatmul.mubr.msk.f32.vlgmr.msra.gmra.mrb[24].mxu0 %vm277_vm1, %v4308_v8  ;;  %3905 = vmatprep.subr.bf16.mxu1 %v4107_v0 }
 0x2e6   : > { %3724 = vmatmul.mubr.msk.f32.vlgmr.msra.gmra.mrb[24].mxu1 %vm277_vm1, %v4308_v8  ;;  %3904 = vmatpush3.bf16.msra.mxu0 %v3903_v4 }
 0x2e7   : > { %3907 = vmatpush3.bf16.msra.mxu1 %v3906_v7  ;;  %3730 = vmatprep.mubr.msk.f32.mxu0 %vm4108_vm0, %v4109_v1 }
 0x2e8   : > { %3737 = vmatprep.mubr.msk.f32.mxu1 %vm4108_vm0, %v4109_v1  ;;  %3908 = vmatprep.subr.bf16.mxu0 %v4107_v0 }
 0x2e9   : > { %3731 = vmatmul.mubr.msk.f32.vlgmr.msra.gmra.mrb[26].mxu0 %vm277_vm1, %v4308_v8  ;;  %3911 = vmatprep.subr.bf16.mxu1 %v4107_v0 }
 0x2ea   : > { %3738 = vmatmul.mubr.msk.f32.vlgmr.msra.gmra.mrb[26].mxu1 %vm277_vm1, %v4308_v8  ;;  %3910 = vmatpush3.bf16.msra.mxu0 %v4334_v17 }
 0x2eb   : > { %3913 = vmatpush3.bf16.msra.mxu1 %v4334_v17  ;;  %3744 = vmatprep.mubr.msk.f32.mxu0 %vm4108_vm0, %v4109_v1 }
 0x2ec   : > { %3751 = vmatprep.mubr.msk.f32.mxu1 %vm4108_vm0, %v4109_v1  ;;  %3914 = vmatprep.subr.bf16.mxu0 %v4107_v0 }
 0x2ed   : > { %3917 = vmatprep.subr.bf16.mxu1 %v4107_v0 }
 0x3b0   : > { %v4596_v40 = vpop.f32.mrb[20].mxu0 }
 0x3b1   : > { %v3177_v43 = vsub.f32 %v4596_v40, %v4486_v14  ;;  %v4600_v44 = vpop.f32.mrb[20].mxu1  ;;  %v3690_v45 = vpop.f32.mrb[21].mxu0 }
 0x3b2   : > { %v3178_v2 = vsub.f32 %v4600_v44, %v4492_v24  ;;  %v3697_v3 = vpop.f32.mrb[21].mxu1 }
 0x3b4   : > { %v4604_v18 = vpop.f32.mrb[22].mxu0 }
 0x3b5   : > { %v3179_v5 = vsub.f32 %v4604_v18, %v4508_v35  ;;  %v4608_v6 = vpop.f32.mrb[22].mxu1  ;;  %v3704_v19 = vpop.f32.mrb[23].mxu0 }
 0x3b6   : > { %v3180_v20 = vsub.f32 %v4608_v6, %v4512_v36  ;;  %v3711_v21 = vpop.f32.mrb[23].mxu1  ;;  %v3238_v6 = vstv %s3417_s30 }
 0x3b7   : > { %v3191_v21 = vmul.f32 2.0, %v4517_v38  ;;  %vm3242_vm2 = vcmp.lt.s32.totalorder %v3238_v6, 8 }
 0x3b8   : > { %v2079_v47 = vpop.f32.mrb[24].mxu0 }
 0x3b9   : > { %v2149_v48 = vpop.f32.mrb[24].mxu1  ;;  %v3718_v50 = vpop.f32.mrb[25].mxu0  ;;  %3745 = vmatmul.mubr.msk.f32.vlgmr.msra.gmra.mrb[28].mxu0 %vm277_vm1, %v2079_v47 }
 0x3ba   : > { %3752 = vmatmul.mubr.msk.f32.vlgmr.msra.gmra.mrb[28].mxu1 %vm277_vm1, %v2149_v48  ;;  %3916 = vmatpush3.bf16.msra.mxu0 %v4334_v17  ;;  %v3725_v24 = vpop.f32.mrb[25].mxu1 }
 0x3bb   : > { %3919 = vmatpush3.bf16.msra.mxu1 %v4334_v17  ;;  %3758 = vmatprep.mubr.msk.f32.mxu0 %vm4108_vm0, %v4109_v1  ;;  %v3239_v24 = vadd.s32 1, %v3238_v6 }
 0x3bc   : > { %v2219_v55 = vpop.f32.mrb[26].mxu0  ;;  %3765 = vmatprep.mubr.msk.f32.mxu1 %vm4108_vm0, %v4109_v1  ;;  %3920 = vmatprep.subr.bf16.mxu0 %v4107_v0 }
 0x3bd   : > { %v2289_v9 = vpop.f32.mrb[26].mxu1  ;;  %v3732_v28 = vpop.f32.mrb[27].mxu0  ;;  %3759 = vmatmul.mubr.msk.f32.vlgmr.msra.gmra.mrb[30].mxu0 %vm277_vm1, %v2219_v55  ;;  %3923 = vmatprep.subr.bf16.mxu1 %v4107_v0  ;;  %vm3243_vm3 = vcmp.lt.s32.totalorder %v3239_v24, 8 }
 0x3be   : > { %3766 = vmatmul.mubr.msk.f32.vlgmr.msra.gmra.mrb[30].mxu1 %vm277_vm1, %v2289_v9  ;;  %3922 = vmatpush3.bf16.msra.mxu0 %v3921_v34  ;;  %v3739_v10 = vpop.f32.mrb[27].mxu1  ;;  %v3192_v9 = vmul.f32 2.0, %v4522_v42 }
 0x3bf   : > { %3925 = vmatpush3.bf16.msra.mxu1 %v3924_v39  ;;  %3772 = vmatprep.mubr.msk.f32.mxu0 %vm4108_vm0, %v4109_v1 }
 0x3c0   : > { %3779 = vmatprep.mubr.msk.f32.mxu1 %vm4108_vm0, %v4109_v1  ;;  %3926 = vmatprep.subr.bf16.mxu0 %v4107_v0 }
 0x3c1   : > { %3773 = vmatmul.mubr.msk.f32.vlgmr.msra.gmra.mrb[32].mxu0 %vm277_vm1, %v4308_v8  ;;  %3929 = vmatprep.subr.bf16.mxu1 %v4107_v0 }
 0x3c2   : > { %3780 = vmatmul.mubr.msk.f32.vlgmr.msra.gmra.mrb[32].mxu1 %vm277_vm1, %v4308_v8  ;;  %3928 = vmatpush3.bf16.msra.mxu0 %v3927_v11  ;;  %v3195_v11 = vadd.f32 0.0001, %v3191_v21 }
 0x3c3   : > { %3931 = vmatpush3.bf16.msra.mxu1 %v3930_v13  ;;  %3786 = vmatprep.mubr.msk.f32.mxu0 %vm4108_vm0, %v4109_v1 }
 0x3c4   : > { %3793 = vmatprep.mubr.msk.f32.mxu1 %vm4108_vm0, %v4109_v1  ;;  %3932 = vmatprep.subr.bf16.mxu0 %v4107_v0 }
 0x3c5   : > { %3787 = vmatmul.mubr.msk.f32.vlgmr.msra.gmra.mrb[34].mxu0 %vm277_vm1, %v4308_v8  ;;  %3935 = vmatprep.subr.bf16.mxu1 %v4107_v0 }
 0x3c6   : > { %3794 = vmatmul.mubr.msk.f32.vlgmr.msra.gmra.mrb[34].mxu1 %vm277_vm1, %v4308_v8  ;;  %3934 = vmatpush3.bf16.msra.mxu0 %v4334_v17 }
 0x3c7   : > { %3937 = vmatpush3.bf16.msra.mxu1 %v4334_v17  ;;  %3800 = vmatprep.mubr.msk.f32.mxu0 %vm4108_vm0, %v4109_v1 }
 0x3c8   : > { %3807 = vmatprep.mubr.msk.f32.mxu1 %vm4108_vm0, %v4109_v1  ;;  %3938 = vmatprep.subr.bf16.mxu0 %v4107_v0 }
 0x3c9   : > { %3941 = vmatprep.subr.bf16.mxu1 %v4107_v0 }
 0x48c   : > { %v2362_v29 = vpop.f32.mrb[28].mxu0 }
 0x48d   : > { %v3181_v31 = vsub.f32 %v2362_v29, %v4488_v15  ;;  %v2435_v32 = vpop.f32.mrb[28].mxu1  ;;  %v3746_v56 = vpop.f32.mrb[29].mxu0  ;;  %v3214_v15 = vadd.f32 0.0001, %v4504_v33 }
 0x48e   : > { %v3182_v8 = vsub.f32 %v2435_v32, %v4494_v25  ;;  %v3753_v57 = vpop.f32.mrb[29].mxu1 }
 0x48f   : > { %v3217_v58 = vadd.f32 %v3181_v31, %v3177_v43 }
 0x490   : > { %v3218_v59 = vadd.f32 %v3182_v8, %v3178_v2  ;;  %v2508_v60 = vpop.f32.mrb[30].mxu0  ;;  %v3240_v8 = vadd.s32 2, %v3238_v6 }
 0x491   : > { %v3221_v62 = vadd.f32 0.0009, %v3217_v58  ;;  %v3183_v63 = vsub.f32 %v2508_v60, %v4514_v37  ;;  %v2581_v0 = vpop.f32.mrb[30].mxu1  ;;  %v3760_v4 = vpop.f32.mrb[31].mxu0  ;;  %v3215_v37 = vadd.f32 0.0001, %v4530_v46 }
 0x492   : > { %v3222_v7 = vadd.f32 0.0009, %v3218_v59  ;;  %v3184_v12 = vsub.f32 %v2581_v0, %v4519_v41  ;;  %v3767_v25 = vpop.f32.mrb[31].mxu1  ;;  %v3216_v41 = vadd.f32 0.0001, %v4538_v49  ;;  %v3241_v59 = vadd.s32 3, %v3238_v6 }
 0x493   : > { %v3225_v22 = vmul.f32 %v3221_v62, %v3213_v61  ;;  %v3219_v14 = vadd.f32 %v3183_v63, %v3179_v5  ;;  %v3196_v60 = vadd.f32 0.0001, %v3192_v9  ;;  %vm3244_vm5 = vcmp.lt.s32.totalorder %v3240_v8, 8 }
 0x494   : > { %v3226_v23 = vmul.f32 %v3222_v7, %v3214_v15  ;;  %v3220_v30 = vadd.f32 %v3184_v12, %v3180_v20  ;;  %v2659_v27 = vpop.f32.mrb[32].mxu0  ;;  %vm3245_vm6 = vcmp.lt.s32.totalorder %v3241_v59, 8 }
 0x495   : > { %v3223_v34 = vadd.f32 0.0009, %v3219_v14  ;;  %v2729_v39 = vpop.f32.mrb[32].mxu1  ;;  %v3774_v33 = vpop.f32.mrb[33].mxu0  ;;  %3801 = vmatmul.mubr.msk.f32.vlgmr.msra.gmra.mrb[36].mxu0 %vm277_vm1, %v2659_v27  ;;  %3995 = vrcp.f32 %v3225_v22 }
 0x496   : > { %v3224_v40 = vadd.f32 0.0009, %v3220_v30  ;;  %3808 = vmatmul.mubr.msk.f32.vlgmr.msra.gmra.mrb[36].mxu1 %vm277_vm1, %v2729_v39  ;;  %3940 = vmatpush3.bf16.msra.mxu0 %v4334_v17  ;;  %v3781_v35 = vpop.f32.mrb[33].mxu1  ;;  %3997 = vrcp.f32 %v3226_v23 }
 0x497   : > { %v3227_v43 = vmul.f32 %v3223_v34, %v3215_v37  ;;  %3943 = vmatpush3.bf16.msra.mxu1 %v4334_v17  ;;  %3814 = vmatprep.mubr.msk.f32.mxu0 %vm4108_vm0, %v4109_v1  ;;  %v3189_v17 = vmul.f32 2.0, %v4490_v16 }
 0x498   : > { %v3228_v36 = vmul.f32 %v3224_v40, %v3216_v41  ;;  %v2799_v46 = vpop.f32.mrb[34].mxu0  ;;  %3821 = vmatprep.mubr.msk.f32.mxu1 %vm4108_vm0, %v4109_v1  ;;  %v3190_v1 = vmul.f32 2.0, %v4496_v26 }
 0x499   : > { %v2869_v44 = vpop.f32.mrb[34].mxu1  ;;  %v3788_v49 = vpop.f32.mrb[35].mxu0  ;;  %3815 = vmatmul.mubr.msk.f32.vlgmr.msra.gmra.mrb[38].mxu0 %vm277_vm1, %v2799_v46  ;;  %3999 = vrcp.f32 %v3227_v43  ;;  %v3193_v51 = vadd.f32 0.0001, %v3189_v17 }
 0x49a   : > { %3822 = vmatmul.mubr.msk.f32.vlgmr.msra.gmra.mrb[38].mxu1 %vm277_vm1, %v2869_v44  ;;  %v3795_v45 = vpop.f32.mrb[35].mxu1  ;;  %4001 = vrcp.f32 %v3228_v36  ;;  %v3194_v55 = vadd.f32 0.0001, %v3190_v1  ;;  %v3275_v49 = vlaneseq }
 0x49c   : > { %v3276_v45 = vand.u32 127, %v3275_v49 }
 0x49e   : > { %vm3277_vm7 = vcmp.eq.s32.totalorder %v3276_v45, 0 }
 0x49f   : > { %v3996_v31 = vpop.eup %3995 }
 0x4a0   : > { %v3998_v57 = vpop.eup %3997 }
 0x4a3   : > { %v4000_v0 = vpop.eup %3999 }
 0x4a4   : > { %v4002_v12 = vpop.eup %4001 }
 0x568   : > { %v2942_v2 = vpop.f32.mrb[36].mxu0 }
 0x569   : > { %v3185_v3 = vsub.f32 %v2942_v2, %v4490_v16  ;;  %v3015_v18 = vpop.f32.mrb[36].mxu1  ;;  %v3802_v5 = vpop.f32.mrb[37].mxu0 }
 0x56a   : > { %v3186_v19 = vsub.f32 %v3015_v18, %v4496_v26  ;;  %v3809_v20 = vpop.f32.mrb[37].mxu1 }
 0x56b   : > { %v3197_v47 = vmul.f32 2.0, %v3185_v3 }
 0x56c   : > { %v3198_v48 = vmul.f32 2.0, %v3186_v19  ;;  %v3088_v50 = vpop.f32.mrb[38].mxu0 }
 0x56d   : > { %v3201_v52 = vadd.f32 0.0009, %v3197_v47  ;;  %v3187_v16 = vsub.f32 %v3088_v50, %v4517_v38  ;;  %v3161_v53 = vpop.f32.mrb[38].mxu1  ;;  %v3816_v54 = vpop.f32.mrb[39].mxu0 }
 0x56e   : > { %v3202_v28 = vadd.f32 0.0009, %v3198_v48  ;;  %v3188_v26 = vsub.f32 %v3161_v53, %v4522_v42  ;;  %v3823_v10 = vpop.f32.mrb[39].mxu1 }
 0x56f   : > { %v3205_v13 = vmul.f32 %v3201_v52, %v3193_v51  ;;  %v3199_v29 = vmul.f32 2.0, %v3187_v16 }
 0x570   : > { %v3206_v32 = vmul.f32 %v3202_v28, %v3194_v55  ;;  %v3200_v56 = vmul.f32 2.0, %v3188_v26 }
 0x571   : > { %v3230_v38 = vmul.f32 %v3996_v31, %v3205_v13  ;;  %v3203_v58 = vadd.f32 0.0009, %v3199_v29 }
 0x572   : > { %v3232_v61 = vmul.f32 %v3998_v57, %v3206_v32  ;;  %v3204_v62 = vadd.f32 0.0009, %v3200_v56 }
 0x573   : > { %v3207_v63 = vmul.f32 %v3203_v58, %v3195_v11  ;;  %v3254_v42 = vsel %vm3242_vm2, %v3230_v38, 0.0 }
 0x574   : > { %v3208_v4 = vmul.f32 %v3204_v62, %v3196_v60  ;;  %v3255_v15 = vsel %vm3243_vm3, %v3232_v61, 0.0  ;;  %v3259_v7 = vsel %vm3258_vm4, %v3254_v42, 0.0 }
 0x575   : > { %v3234_v25 = vmul.f32 %v4000_v0, %v3207_v63  ;;  %v3260_v22 = vsel %vm3258_vm4, %v3255_v15, 0.0 }
 0x576   : > { %v3236_v14 = vmul.f32 %v4002_v12, %v3208_v4  ;;  %v3261_v23 = vadd.f32 %v3260_v22, %v3259_v7 }
 0x577   : > { %v3256_v30 = vsel %vm3244_vm5, %v3234_v25, 0.0 }
 0x578   : > { %v3257_v27 = vsel %vm3245_vm6, %v3236_v14, 0.0  ;;  %v3262_v37 = vsel %vm3258_vm4, %v3256_v30, 0.0 }
 0x579   : > { %v3263_v34 = vadd.f32 %v3262_v37, %v3261_v23  ;;  %v3264_v39 = vsel %vm3258_vm4, %v3257_v27, 0.0 }
 0x57b   : > { %v3265_v33 = vadd.f32 %v3264_v39, %v3263_v34 }
 0x57d   : > { %3266 = vadd.xlane.f32.xlu0 %v3265_v33 }
 0x60a   : > { %v3267_v41 = vpop.xlane.xlu0 %3266 }
 0x60b   : > { %v3268_v40 = vrot.slane %v3267_v41, 4 }
 0x60d   : > { %v3269_v35 = vadd.f32 %v3268_v40, %v3267_v41 }
 0x60f   : > { %v3270_v43 = vrot.slane %v3269_v35, 2 }
 0x611   : > { %v3271_v36 = vadd.f32 %v3270_v43, %v3269_v35 }
 0x613   : > { %v3272_v46 = vrot.slane %v3271_v36, 1 }
 0x615   : > { %v3273_v44 = vadd.f32 %v3272_v46, %v3271_v36 }
 0x617   : > { %3944 = vpush %v3273_v44 }
 0x648   : > { %s3945_s21 = spop %3944 }
 0x649   : > { %v3278_v2 = vstv %s3945_s21 }
 0x64a   : > { %v3279_v17 = vsel %vm3277_vm7, %v3278_v2, 0.0 }
 0x64b   : > { %3280 = vst [vmem:[%s257_s15] sm:$0x1] %v3279_v17 }
 0x64c PF: > { %p17_p11 = scmp.ge.s32.totalorder %s4157_s20, 4   ;;  %s4729_s15 = smov %s4093_s16 }
 0x64d   : > { %s4730_s16 = smov %s4097_s17  ;;  %s4731_s17 = smov %s4167_s23 }
 0x64e   : > { %s4732_s18 = smov %s4157_s20  ;;  %19 = sbr.rel (!%p17_p11) target bundleno = 5 (0x5), region = 89 }
 0x655   :  { %3298 = vsyncpa [#allocation3], 1 }
 0x656   :  { %3300 = vsyncpa [#allocation3 + $0x1], 1 }
 0x657   :  { %3301 = vsyncpa [#allocation5], 1 }
 0x658   :  { %3303 = vsyncpa [#allocation5 + $0x1], 1 }

</bundles_post_ra>
